<compile_context>
chip_gen: v6e
topology: v6e:2x2x1
jax: 0.10.0
libtpu: 0.0.40
codegen_flags: <defaults>
</compile_context>

<pallas_src>
import functools
import math

import jax
import jax.numpy as jnp
from jax.experimental import pallas as pl
from jax.experimental.pallas import tpu as pltpu


# ---------------------------------------------------------------------------
# Helpers
# ---------------------------------------------------------------------------
def _round_up(x, m):
    return ((x + m - 1) // m) * m


def _pad2d(x, rows, cols, dtype):
    x = x.astype(dtype)
    if x.shape == (rows, cols):
        return x
    return jnp.zeros((rows, cols), dtype).at[: x.shape[0], : x.shape[1]].set(x)


# ---------------------------------------------------------------------------
# Pallas kernel: tiled fused matmul   out = [relu](A @ B + bias)
# ---------------------------------------------------------------------------
def _fused_matmul_kernel(a_ref, b_ref, bias_ref, o_ref, acc_ref, *, relu):
    k = pl.program_id(2)

    @pl.when(k == 0)
    def _():
        acc_ref[...] = jnp.zeros_like(acc_ref)

    # bf16 x bf16 -> f32 accumulate on the MXU
    acc_ref[...] += jnp.dot(
        a_ref[...], b_ref[...], preferred_element_type=jnp.float32
    )

    @pl.when(k == pl.num_programs(2) - 1)
    def _():
        out = acc_ref[...] + bias_ref[...]          # bias + ReLU epilogue (VPU, f32)
        if relu:
            out = jnp.maximum(out, 0.0)
        o_ref[...] = out.astype(o_ref.dtype)


def fused_matmul(a, b, bias=None, *, relu=False, out_dtype=jnp.float32,
                 tm=256, tn=256, tk=256):
    """Tiled (A @ B + bias), optional ReLU.

    Operands are cast to bf16, accumulation is f32 in a VMEM scratch.  All
    dimensions are zero-padded to tile multiples so loads/stores are
    (8,128)-aligned and the output store is lane-dense; the result is sliced
    back to the logical shape.
    """
    M, K = a.shape
    Kb, N = b.shape
    assert K == Kb, (a.shape, b.shape)

    # Clamp tile sizes to the (8, 128)-aligned problem size.
    tm = min(tm, _round_up(M, 8))
    tn = min(tn, _round_up(N, 128))
    tk = min(tk, _round_up(K, 128))
    Mp, Kp, Np = _round_up(M, tm), _round_up(K, tk), _round_up(N, tn)

    a_p = _pad2d(a, Mp, Kp, jnp.bfloat16)
    b_p = _pad2d(b, Kp, Np, jnp.bfloat16)
    if bias is None:
        bias_p = jnp.zeros((1, Np), jnp.float32)
    else:
        bias_p = jnp.zeros((1, Np), jnp.float32).at[0, :N].set(
            bias.astype(jnp.float32)
        )

    grid = (Mp // tm, Np // tn, Kp // tk)

    out = pl.pallas_call(
        functools.partial(_fused_matmul_kernel, relu=relu),
        out_shape=jax.ShapeDtypeStruct((Mp, Np), out_dtype),
        grid_spec=pltpu.PrefetchScalarGridSpec(
            num_scalar_prefetch=0,
            grid=grid,
            in_specs=[
                pl.BlockSpec((tm, tk), lambda i, j, k: (i, k)),
                pl.BlockSpec((tk, tn), lambda i, j, k: (k, j)),
                pl.BlockSpec((1, tn), lambda i, j, k: (0, j)),
            ],
            out_specs=pl.BlockSpec((tm, tn), lambda i, j, k: (i, j)),
            scratch_shapes=[pltpu.VMEM((tm, tn), jnp.float32)],
        ),
        compiler_params=pltpu.CompilerParams(
            dimension_semantics=("parallel", "parallel", "arbitrary"),
            vmem_limit_bytes=32 * 1024 * 1024,  # safe on v5e/v6e/v7x, tiles are small
        ),
    )(a_p, b_p, bias_p)

    if (Mp, Np) != (M, N):
        out = out[:M, :N]
    return out


# ---------------------------------------------------------------------------
# GCN layer:  H = relu( Â @ (X @ W) + b )
# ---------------------------------------------------------------------------
def gcn_layer(a_hat, x, w, b):
    f_in, f_out = w.shape
    if f_in < f_out:
        # (Â @ X) @ W : the N²-sized contraction uses the smaller F_in width.
        ax = fused_matmul(a_hat, x, out_dtype=jnp.bfloat16)
        return fused_matmul(ax, w, b, relu=True)
    else:
        # Â @ (X @ W) : feature transform hoisted out of the Â-streaming matmul.
        xw = fused_matmul(x, w, out_dtype=jnp.bfloat16)
        return fused_matmul(a_hat, xw, b, relu=True)


# ---------------------------------------------------------------------------
# Glue: normalized adjacency + parameters
# ---------------------------------------------------------------------------
def build_normalized_adj(edge_index, num_nodes):
    """Dense Â = D^{-1/2} (A + I) D^{-1/2}, matching PyG GCNConv gcn_norm."""
    # TODO(synk): for realistically sparse graphs replace this dense Â with a
    # block-sparse tiling (PrefetchScalarGridSpec per-row-tile column lists).
    src, dst = edge_index[0], edge_index[1]
    a = jnp.zeros((num_nodes, num_nodes), dtype=jnp.float32)
    a = a.at[dst, src].set(1.0)                              # message src -> dst
    a = a + jnp.eye(num_nodes, dtype=jnp.float32)            # self loops
    deg = a.sum(axis=1)
    dinv = jnp.where(deg > 0, 1.0 / jnp.sqrt(deg), 0.0)
    a_hat = dinv[:, None] * a * dinv[None, :]
    # Â is the dominant byte traffic -> store in bf16 (f32 accumulation in-kernel).
    return a_hat.astype(jnp.bfloat16)


def xavier_uniform(key, fan_in, fan_out):
    bound = math.sqrt(6.0 / (fan_in + fan_out))
    return jax.random.uniform(
        key, (fan_in, fan_out), dtype=jnp.float32, minval=-bound, maxval=bound
    )


def init_gnn_params(key, in_channels, out_channels, hidden=128):
    k1, k2, k3 = jax.random.split(key, 3)
    return {
        "w1": xavier_uniform(k1, in_channels, hidden),
        "b1": jnp.zeros((hidden,), jnp.float32),
        "w2": xavier_uniform(k2, hidden, hidden),
        "b2": jnp.zeros((hidden,), jnp.float32),
        "w3": xavier_uniform(k3, hidden, out_channels),
        "b3": jnp.zeros((out_channels,), jnp.float32),
    }


@jax.jit
def gnn_embeds_forward(params, x, edge_index, batch):
    # `batch` is unused in the forward pass (as in the PyTorch module).
    n = x.shape[0]
    a_hat = build_normalized_adj(edge_index, n)
    h = gcn_layer(a_hat, x, params["w1"], params["b1"])
    h = gcn_layer(a_hat, h, params["w2"], params["b2"])
    h = gcn_layer(a_hat, h, params["w3"], params["b3"])
    return h


# ---------------------------------------------------------------------------
# Main
# ---------------------------------------------------------------------------
if __name__ == "__main__":
    key = jax.random.PRNGKey(0)
    kx, kp = jax.random.split(key)

    num_nodes = 8
    in_channels = 4
    out_channels = 32

    # node features
    x = jax.random.normal(kx, (num_nodes, in_channels), dtype=jnp.float32)

    # a small deterministic edge list (src row, dst row), both directions
    edge_index = jnp.array(
        [
            [0, 1, 1, 2, 2, 3, 3, 4, 4, 5, 5, 6, 6, 7],
            [1, 0, 2, 1, 3, 2, 4, 3, 5, 4, 6, 5, 7, 6],
        ],
        dtype=jnp.int32,
    )
    batch = jnp.zeros((num_nodes,), dtype=jnp.int32)

    params = init_gnn_params(kp, in_channels, out_channels)

    out = gnn_embeds_forward(params, x, edge_index, batch)
    out = jax.block_until_ready(out)

    assert out.shape == (num_nodes, out_channels)
    assert bool(jnp.all(out >= 0.0))  # ReLU output
    assert bool(jnp.all(jnp.isfinite(out)))
    print("KERNEL_OK")
</pallas_src>

<mosaic_0001>
module attributes {stable_mosaic.version = 11 : i64} {
  func.func @_fused_matmul_kernel(%arg0: i32, %arg1: i32, %arg2: i32, %arg3: memref<8x128xbf16, #tpu.memory_space<vmem>>, %arg4: memref<128x128xbf16, #tpu.memory_space<vmem>>, %arg5: memref<1x128xf32, #tpu.memory_space<vmem>>, %arg6: memref<8x128xbf16, #tpu.memory_space<vmem>>, %arg7: memref<8x128xf32, #tpu.memory_space<vmem>>) attributes {dimension_semantics = [#tpu.dimension_semantics<parallel>, #tpu.dimension_semantics<parallel>, #tpu.dimension_semantics<arbitrary>], iteration_bounds = array<i64: 1, 1, 1>, scalar_prefetch = 0 : i64, scratch_operands = 1 : i64, tpu.core_type = #tpu.core_type<tc>, window_params = [{transform_indices = @transform_0, window_bounds = array<i64: 8, 128>}, {transform_indices = @transform_1, window_bounds = array<i64: 128, 128>}, {transform_indices = @transform_2, window_bounds = array<i64: 1, 128>}, {transform_indices = @transform_3, window_bounds = array<i64: 8, 128>}]} {
    %c0_i32 = arith.constant 0 : i32
    %0 = arith.cmpi eq, %arg2, %c0_i32 : i32
    %1 = arith.extui %0 : i1 to i32
    %c0_i32_0 = arith.constant 0 : i32
    %2 = arith.cmpi ne, %1, %c0_i32_0 : i32
    scf.if %2 {
      %cst_10 = arith.constant 0.000000e+00 : f32
      %12 = vector.broadcast %cst_10 : f32 to vector<8x128xf32>
      %c0_11 = arith.constant 0 : index
      %c0_12 = arith.constant 0 : index
      %13 = vector.load %arg7[%c0_11, %c0_12] : memref<8x128xf32, #tpu.memory_space<vmem>>, vector<8x128xf32>
      tpu.vector_store %arg7[%c0_11, %c0_12], %12 {strides = array<i32>} : memref<8x128xf32, #tpu.memory_space<vmem>>, vector<8x128xf32>,
    } else {
    }
    %c0 = arith.constant 0 : index
    %c0_1 = arith.constant 0 : index
    %3 = vector.load %arg7[%c0, %c0_1] : memref<8x128xf32, #tpu.memory_space<vmem>>, vector<8x128xf32>
    %c0_2 = arith.constant 0 : index
    %c0_3 = arith.constant 0 : index
    %4 = vector.load %arg3[%c0_2, %c0_3] : memref<8x128xbf16, #tpu.memory_space<vmem>>, vector<8x128xbf16>
    %c0_4 = arith.constant 0 : index
    %c0_5 = arith.constant 0 : index
    %5 = vector.load %arg4[%c0_4, %c0_5] : memref<128x128xbf16, #tpu.memory_space<vmem>>, vector<128x128xbf16>
    %cst = arith.constant dense<0.000000e+00> : vector<8x128xf32>
    %6 = tpu.matmul %4, %5, %cst {dimension_numbers = #tpu.dot_dimension_numbers<[1], [0], [0], [1], [0, 0, 1, 1], [], []>} : vector<8x128xbf16>, vector<128x128xbf16>, vector<8x128xf32> -> vector<8x128xf32>
    %7 = arith.addf %3, %6 : vector<8x128xf32>
    %c0_6 = arith.constant 0 : index
    %c0_7 = arith.constant 0 : index
    %8 = vector.load %arg7[%c0_6, %c0_7] : memref<8x128xf32, #tpu.memory_space<vmem>>, vector<8x128xf32>
    tpu.vector_store %arg7[%c0_6, %c0_7], %7 {strides = array<i32>} : memref<8x128xf32, #tpu.memory_space<vmem>>, vector<8x128xf32>,
    %c0_i32_8 = arith.constant 0 : i32
    %9 = arith.cmpi eq, %arg2, %c0_i32_8 : i32
    %10 = arith.extui %9 : i1 to i32
    %c0_i32_9 = arith.constant 0 : i32
    %11 = arith.cmpi ne, %10, %c0_i32_9 : i32
    scf.if %11 {
      %c0_10 = arith.constant 0 : index
      %c0_11 = arith.constant 0 : index
      %12 = vector.load %arg7[%c0_10, %c0_11] : memref<8x128xf32, #tpu.memory_space<vmem>>, vector<8x128xf32>
      %c0_12 = arith.constant 0 : index
      %c0_13 = arith.constant 0 : index
      %13 = vector.load %arg5[%c0_12, %c0_13] : memref<1x128xf32, #tpu.memory_space<vmem>>, vector<1x128xf32>
      %14 = vector.broadcast %13 : vector<1x128xf32> to vector<8x128xf32>
      %15 = arith.addf %12, %14 : vector<8x128xf32>
      %16 = arith.truncf %15 : vector<8x128xf32> to vector<8x128xbf16>
      %c0_14 = arith.constant 0 : index
      %c0_15 = arith.constant 0 : index
      %17 = vector.load %arg6[%c0_14, %c0_15] : memref<8x128xbf16, #tpu.memory_space<vmem>>, vector<8x128xbf16>
      tpu.vector_store %arg6[%c0_14, %c0_15], %16 {strides = array<i32>} : memref<8x128xbf16, #tpu.memory_space<vmem>>, vector<8x128xbf16>,
    } else {
    }
    return
  }
  func.func @transform_0(%arg0: i32, %arg1: i32, %arg2: i32) -> (i32, i32) {
    %c0_i32 = arith.constant 0 : i32
    return %arg0, %arg2 : i32, i32
  }
  func.func @transform_1(%arg0: i32, %arg1: i32, %arg2: i32) -> (i32, i32) {
    %c0_i32 = arith.constant 0 : i32
    return %arg2, %arg1 : i32, i32
  }
  func.func @transform_2(%arg0: i32, %arg1: i32, %arg2: i32) -> (i32, i32) {
    %c0_i32 = arith.constant 0 : i32
    %c0_i32_0 = arith.constant 0 : i32
    return %c0_i32, %arg1 : i32, i32
  }
  func.func @transform_3(%arg0: i32, %arg1: i32, %arg2: i32) -> (i32, i32) {
    %c0_i32 = arith.constant 0 : i32
    return %arg0, %arg1 : i32, i32
  }
}

module attributes {stable_mosaic.version = 11 : i64} {
  func.func @_fused_matmul_kernel(%arg0: i32, %arg1: i32, %arg2: i32, %arg3: memref<8x128xbf16, #tpu.memory_space<vmem>>, %arg4: memref<128x128xbf16, #tpu.memory_space<vmem>>, %arg5: memref<1x128xf32, #tpu.memory_space<vmem>>, %arg6: memref<8x128xf32, #tpu.memory_space<vmem>>, %arg7: memref<8x128xf32, #tpu.memory_space<vmem>>) attributes {dimension_semantics = [#tpu.dimension_semantics<parallel>, #tpu.dimension_semantics<parallel>, #tpu.dimension_semantics<arbitrary>], iteration_bounds = array<i64: 1, 1, 1>, scalar_prefetch = 0 : i64, scratch_operands = 1 : i64, tpu.core_type = #tpu.core_type<tc>, window_params = [{transform_indices = @transform_0, window_bounds = array<i64: 8, 128>}, {transform_indices = @transform_1, window_bounds = array<i64: 128, 128>}, {transform_indices = @transform_2, window_bounds = array<i64: 1, 128>}, {transform_indices = @transform_3, window_bounds = array<i64: 8, 128>}]} {
    %c0_i32 = arith.constant 0 : i32
    %0 = arith.cmpi eq, %arg2, %c0_i32 : i32
    %1 = arith.extui %0 : i1 to i32
    %c0_i32_0 = arith.constant 0 : i32
    %2 = arith.cmpi ne, %1, %c0_i32_0 : i32
    scf.if %2 {
      %cst_10 = arith.constant 0.000000e+00 : f32
      %12 = vector.broadcast %cst_10 : f32 to vector<8x128xf32>
      %c0_11 = arith.constant 0 : index
      %c0_12 = arith.constant 0 : index
      %13 = vector.load %arg7[%c0_11, %c0_12] : memref<8x128xf32, #tpu.memory_space<vmem>>, vector<8x128xf32>
      tpu.vector_store %arg7[%c0_11, %c0_12], %12 {strides = array<i32>} : memref<8x128xf32, #tpu.memory_space<vmem>>, vector<8x128xf32>,
    } else {
    }
    %c0 = arith.constant 0 : index
    %c0_1 = arith.constant 0 : index
    %3 = vector.load %arg7[%c0, %c0_1] : memref<8x128xf32, #tpu.memory_space<vmem>>, vector<8x128xf32>
    %c0_2 = arith.constant 0 : index
    %c0_3 = arith.constant 0 : index
    %4 = vector.load %arg3[%c0_2, %c0_3] : memref<8x128xbf16, #tpu.memory_space<vmem>>, vector<8x128xbf16>
    %c0_4 = arith.constant 0 : index
    %c0_5 = arith.constant 0 : index
    %5 = vector.load %arg4[%c0_4, %c0_5] : memref<128x128xbf16, #tpu.memory_space<vmem>>, vector<128x128xbf16>
    %cst = arith.constant dense<0.000000e+00> : vector<8x128xf32>
    %6 = tpu.matmul %4, %5, %cst {dimension_numbers = #tpu.dot_dimension_numbers<[1], [0], [0], [1], [0, 0, 1, 1], [], []>} : vector<8x128xbf16>, vector<128x128xbf16>, vector<8x128xf32> -> vector<8x128xf32>
    %7 = arith.addf %3, %6 : vector<8x128xf32>
    %c0_6 = arith.constant 0 : index
    %c0_7 = arith.constant 0 : index
    %8 = vector.load %arg7[%c0_6, %c0_7] : memref<8x128xf32, #tpu.memory_space<vmem>>, vector<8x128xf32>
    tpu.vector_store %arg7[%c0_6, %c0_7], %7 {strides = array<i32>} : memref<8x128xf32, #tpu.memory_space<vmem>>, vector<8x128xf32>,
    %c0_i32_8 = arith.constant 0 : i32
    %9 = arith.cmpi eq, %arg2, %c0_i32_8 : i32
    %10 = arith.extui %9 : i1 to i32
    %c0_i32_9 = arith.constant 0 : i32
    %11 = arith.cmpi ne, %10, %c0_i32_9 : i32
    scf.if %11 {
      %c0_10 = arith.constant 0 : index
      %c0_11 = arith.constant 0 : index
      %12 = vector.load %arg7[%c0_10, %c0_11] : memref<8x128xf32, #tpu.memory_space<vmem>>, vector<8x128xf32>
      %c0_12 = arith.constant 0 : index
      %c0_13 = arith.constant 0 : index
      %13 = vector.load %arg5[%c0_12, %c0_13] : memref<1x128xf32, #tpu.memory_space<vmem>>, vector<1x128xf32>
      %14 = vector.broadcast %13 : vector<1x128xf32> to vector<8x128xf32>
      %15 = arith.addf %12, %14 : vector<8x128xf32>
      %cst_14 = arith.constant 0.000000e+00 : f32
      %16 = vector.broadcast %cst_14 : f32 to vector<8x128xf32>
      %17 = arith.maximumf %15, %16 : vector<8x128xf32>
      %c0_15 = arith.constant 0 : index
      %c0_16 = arith.constant 0 : index
      %18 = vector.load %arg6[%c0_15, %c0_16] : memref<8x128xf32, #tpu.memory_space<vmem>>, vector<8x128xf32>
      tpu.vector_store %arg6[%c0_15, %c0_16], %17 {strides = array<i32>} : memref<8x128xf32, #tpu.memory_space<vmem>>, vector<8x128xf32>,
    } else {
    }
    return
  }
  func.func @transform_0(%arg0: i32, %arg1: i32, %arg2: i32) -> (i32, i32) {
    %c0_i32 = arith.constant 0 : i32
    return %arg0, %arg2 : i32, i32
  }
  func.func @transform_1(%arg0: i32, %arg1: i32, %arg2: i32) -> (i32, i32) {
    %c0_i32 = arith.constant 0 : i32
    return %arg2, %arg1 : i32, i32
  }
  func.func @transform_2(%arg0: i32, %arg1: i32, %arg2: i32) -> (i32, i32) {
    %c0_i32 = arith.constant 0 : i32
    %c0_i32_0 = arith.constant 0 : i32
    return %c0_i32, %arg1 : i32, i32
  }
  func.func @transform_3(%arg0: i32, %arg1: i32, %arg2: i32) -> (i32, i32) {
    %c0_i32 = arith.constant 0 : i32
    return %arg0, %arg1 : i32, i32
  }
}

module attributes {stable_mosaic.version = 11 : i64} {
  func.func @_fused_matmul_kernel(%arg0: i32, %arg1: i32, %arg2: i32, %arg3: memref<8x128xbf16, #tpu.memory_space<vmem>>, %arg4: memref<128x128xbf16, #tpu.memory_space<vmem>>, %arg5: memref<1x128xf32, #tpu.memory_space<vmem>>, %arg6: memref<8x128xf32, #tpu.memory_space<vmem>>, %arg7: memref<8x128xf32, #tpu.memory_space<vmem>>) attributes {dimension_semantics = [#tpu.dimension_semantics<parallel>, #tpu.dimension_semantics<parallel>, #tpu.dimension_semantics<arbitrary>], iteration_bounds = array<i64: 1, 1, 1>, scalar_prefetch = 0 : i64, scratch_operands = 1 : i64, tpu.core_type = #tpu.core_type<tc>, window_params = [{transform_indices = @transform_0, window_bounds = array<i64: 8, 128>}, {transform_indices = @transform_1, window_bounds = array<i64: 128, 128>}, {transform_indices = @transform_2, window_bounds = array<i64: 1, 128>}, {transform_indices = @transform_3, window_bounds = array<i64: 8, 128>}]} {
    %c0_i32 = arith.constant 0 : i32
    %0 = arith.cmpi eq, %arg2, %c0_i32 : i32
    %1 = arith.extui %0 : i1 to i32
    %c0_i32_0 = arith.constant 0 : i32
    %2 = arith.cmpi ne, %1, %c0_i32_0 : i32
    scf.if %2 {
      %cst_10 = arith.constant 0.000000e+00 : f32
      %12 = vector.broadcast %cst_10 : f32 to vector<8x128xf32>
      %c0_11 = arith.constant 0 : index
      %c0_12 = arith.constant 0 : index
      %13 = vector.load %arg7[%c0_11, %c0_12] : memref<8x128xf32, #tpu.memory_space<vmem>>, vector<8x128xf32>
      tpu.vector_store %arg7[%c0_11, %c0_12], %12 {strides = array<i32>} : memref<8x128xf32, #tpu.memory_space<vmem>>, vector<8x128xf32>,
    } else {
    }
    %c0 = arith.constant 0 : index
    %c0_1 = arith.constant 0 : index
    %3 = vector.load %arg7[%c0, %c0_1] : memref<8x128xf32, #tpu.memory_space<vmem>>, vector<8x128xf32>
    %c0_2 = arith.constant 0 : index
    %c0_3 = arith.constant 0 : index
    %4 = vector.load %arg3[%c0_2, %c0_3] : memref<8x128xbf16, #tpu.memory_space<vmem>>, vector<8x128xbf16>
    %c0_4 = arith.constant 0 : index
    %c0_5 = arith.constant 0 : index
    %5 = vector.load %arg4[%c0_4, %c0_5] : memref<128x128xbf16, #tpu.memory_space<vmem>>, vector<128x128xbf16>
    %cst = arith.constant dense<0.000000e+00> : vector<8x128xf32>
    %6 = tpu.matmul %4, %5, %cst {dimension_numbers = #tpu.dot_dimension_numbers<[1], [0], [0], [1], [0, 0, 1, 1], [], []>} : vector<8x128xbf16>, vector<128x128xbf16>, vector<8x128xf32> -> vector<8x128xf32>
    %7 = arith.addf %3, %6 : vector<8x128xf32>
    %c0_6 = arith.constant 0 : index
    %c0_7 = arith.constant 0 : index
    %8 = vector.load %arg7[%c0_6, %c0_7] : memref<8x128xf32, #tpu.memory_space<vmem>>, vector<8x128xf32>
    tpu.vector_store %arg7[%c0_6, %c0_7], %7 {strides = array<i32>} : memref<8x128xf32, #tpu.memory_space<vmem>>, vector<8x128xf32>,
    %c0_i32_8 = arith.constant 0 : i32
    %9 = arith.cmpi eq, %arg2, %c0_i32_8 : i32
    %10 = arith.extui %9 : i1 to i32
    %c0_i32_9 = arith.constant 0 : i32
    %11 = arith.cmpi ne, %10, %c0_i32_9 : i32
    scf.if %11 {
      %c0_10 = arith.constant 0 : index
      %c0_11 = arith.constant 0 : index
      %12 = vector.load %arg7[%c0_10, %c0_11] : memref<8x128xf32, #tpu.memory_space<vmem>>, vector<8x128xf32>
      %c0_12 = arith.constant 0 : index
      %c0_13 = arith.constant 0 : index
      %13 = vector.load %arg5[%c0_12, %c0_13] : memref<1x128xf32, #tpu.memory_space<vmem>>, vector<1x128xf32>
      %14 = vector.broadcast %13 : vector<1x128xf32> to vector<8x128xf32>
      %15 = arith.addf %12, %14 : vector<8x128xf32>
      %cst_14 = arith.constant 0.000000e+00 : f32
      %16 = vector.broadcast %cst_14 : f32 to vector<8x128xf32>
      %17 = arith.maximumf %15, %16 : vector<8x128xf32>
      %c0_15 = arith.constant 0 : index
      %c0_16 = arith.constant 0 : index
      %18 = vector.load %arg6[%c0_15, %c0_16] : memref<8x128xf32, #tpu.memory_space<vmem>>, vector<8x128xf32>
      tpu.vector_store %arg6[%c0_15, %c0_16], %17 {strides = array<i32>} : memref<8x128xf32, #tpu.memory_space<vmem>>, vector<8x128xf32>,
    } else {
    }
    return
  }
  func.func @transform_0(%arg0: i32, %arg1: i32, %arg2: i32) -> (i32, i32) {
    %c0_i32 = arith.constant 0 : i32
    return %arg0, %arg2 : i32, i32
  }
  func.func @transform_1(%arg0: i32, %arg1: i32, %arg2: i32) -> (i32, i32) {
    %c0_i32 = arith.constant 0 : i32
    return %arg2, %arg1 : i32, i32
  }
  func.func @transform_2(%arg0: i32, %arg1: i32, %arg2: i32) -> (i32, i32) {
    %c0_i32 = arith.constant 0 : i32
    %c0_i32_0 = arith.constant 0 : i32
    return %c0_i32, %arg1 : i32, i32
  }
  func.func @transform_3(%arg0: i32, %arg1: i32, %arg2: i32) -> (i32, i32) {
    %c0_i32 = arith.constant 0 : i32
    return %arg0, %arg1 : i32, i32
  }
}

</mosaic_0001>

<bundles_post_ra>
// kernel: gnn_embeds_forward.6
= control target key start
LH: loop header
LB: loop body
LE: loop exit
PB: predicated region body
PF: predicated region fallthrough
CT: control target
= control target key end

     0   :  { %v194_v0 = vmov 0.0   ;;  %vm195_vm0 = vmmov 0   ;;  %s249_s1 = inlined_call_operand.vmem [shape: bf16[128,128], index: 1, kind: input, shape index: {}]   ;;  %s250_s0 = inlined_call_operand.vmem [shape: bf16[8,128], index: 0, kind: input, shape index: {}]   ;;  %s251_s2 = inlined_call_operand.vmem [shape: f32[1,128], index: 2, kind: input, shape index: {}]   ;;  %s252_s3 = inlined_call_operand.vmem [shape: bf16[8,128], index: 3, kind: output, shape index: {}]  }
   0x1   :  { %164 = vmatprep.subr.bf16.mxu0 %v194_v0  ;;  %v186_v1 = vld [vmem:[%s249_s1 + $0x38] sm:$0xff]   ;;  %180 = vmatprep.mubr.msk.bf16.mxu0 %vm195_vm0, %v194_v0  ;;  %v187_v2 = vld [vmem:[%s249_s1 + $0x30] sm:$0xff]   ;;  %v188_v3 = vld [vmem:[%s249_s1 + $0x28] sm:$0xff]  }
   0x2   :  { %165 = vmatpush3.bf16.msra.mxu0 %v186_v1  ;;  %v189_v4 = vld [vmem:[%s249_s1 + $0x20] sm:$0xff]   ;;  %v190_v5 = vld [vmem:[%s249_s1 + $0x18] sm:$0xff]   ;;  %v191_v6 = vld [vmem:[%s249_s1 + $0x10] sm:$0xff]  }
   0x3   :  { %166 = vmatprep.subr.bf16.mxu0 %v194_v0  ;;  %v192_v7 = vld [vmem:[%s249_s1 + $0x8] sm:$0xff]   ;;  %v193_v8 = vld [vmem:[%s249_s1] sm:$0xff]  }
   0x4   :  { %v21_v9 = vld [vmem:[%s250_s0] sm:$0xf] }
   0x5   :  { %v154_v10 = vld [vmem:[%s251_s2] ss:$0 sm:$0xff] }
   0x6   :  { %167 = vmatpush3.bf16.msra.mxu0 %v187_v2 }
   0x7   :  { %168 = vmatprep.subr.bf16.mxu0 %v194_v0 }
   0xa   :  { %169 = vmatpush3.bf16.msra.mxu0 %v188_v3 }
   0xb   :  { %170 = vmatprep.subr.bf16.mxu0 %v194_v0 }
   0xe   :  { %171 = vmatpush3.bf16.msra.mxu0 %v189_v4 }
   0xf   :  { %172 = vmatprep.subr.bf16.mxu0 %v194_v0 }
  0x12   :  { %173 = vmatpush3.bf16.msra.mxu0 %v190_v5 }
  0x13   :  { %174 = vmatprep.subr.bf16.mxu0 %v194_v0 }
  0x16   :  { %175 = vmatpush3.bf16.msra.mxu0 %v191_v6 }
  0x17   :  { %176 = vmatprep.subr.bf16.mxu0 %v194_v0 }
  0x1a   :  { %177 = vmatpush3.bf16.msra.mxu0 %v192_v7 }
  0x1b   :  { %178 = vmatprep.subr.bf16.mxu0 %v194_v0 }
  0x1e   :  { %179 = vmatpush3.bf16.msra.mxu0 %v193_v8 }
  0x21   :  { %181 = vmatmul.mubr.bf16.vlgmr.msra.gmra.mxu0 %v21_v9 }
  0xe1   :  { %v120_v11 = vpop.f32.mrf.mxu0 }
  0xe2   :  { %v139_v12 = vadd.f32 %v154_v10, %v120_v11 }
  0xe3   :  { %v182_v13 = vpop.f32.mrf.mxu0 }
  0xe4   :  { %v140_v14 = vpack.c.bf16 %v139_v12, %v139_v12 }
  0xe5   :  { %v123_v15 = vpop.f32.mrf.mxu0 }
  0xe6   :  { %141 = vst [vmem:[%s252_s3] sm:$0xf] %v140_v14 }
  0xe7   :  { %v183_v16 = vpop.f32.mrf.mxu0 }

// kernel: gnn_embeds_forward.7
= control target key start
LH: loop header
LB: loop body
LE: loop exit
PB: predicated region body
PF: predicated region fallthrough
CT: control target
= control target key end

     0   :  { %v194_v0 = vmov 0.0   ;;  %vm195_vm0 = vmmov 0   ;;  %s249_s1 = inlined_call_operand.vmem [shape: bf16[128,128], index: 1, kind: input, shape index: {}]   ;;  %s250_s0 = inlined_call_operand.vmem [shape: bf16[8,128], index: 0, kind: input, shape index: {}]   ;;  %s251_s2 = inlined_call_operand.vmem [shape: f32[1,128], index: 2, kind: input, shape index: {}]   ;;  %s252_s3 = inlined_call_operand.vmem [shape: f32[8,128], index: 3, kind: output, shape index: {}]  }
   0x1   :  { %164 = vmatprep.subr.bf16.mxu0 %v194_v0  ;;  %v186_v1 = vld [vmem:[%s249_s1 + $0x38] sm:$0xff]   ;;  %180 = vmatprep.mubr.msk.bf16.mxu0 %vm195_vm0, %v194_v0  ;;  %v187_v2 = vld [vmem:[%s249_s1 + $0x30] sm:$0xff]   ;;  %v188_v3 = vld [vmem:[%s249_s1 + $0x28] sm:$0xff]  }
   0x2   :  { %165 = vmatpush3.bf16.msra.mxu0 %v186_v1  ;;  %v189_v4 = vld [vmem:[%s249_s1 + $0x20] sm:$0xff]   ;;  %v190_v5 = vld [vmem:[%s249_s1 + $0x18] sm:$0xff]   ;;  %v191_v6 = vld [vmem:[%s249_s1 + $0x10] sm:$0xff]  }
   0x3   :  { %166 = vmatprep.subr.bf16.mxu0 %v194_v0  ;;  %v192_v7 = vld [vmem:[%s249_s1 + $0x8] sm:$0xff]   ;;  %v193_v8 = vld [vmem:[%s249_s1] sm:$0xff]  }
   0x4   :  { %v21_v9 = vld [vmem:[%s250_s0] sm:$0xf] }
   0x5   :  { %v154_v10 = vld [vmem:[%s251_s2] ss:$0 sm:$0xff] }
   0x6   :  { %167 = vmatpush3.bf16.msra.mxu0 %v187_v2 }
   0x7   :  { %168 = vmatprep.subr.bf16.mxu0 %v194_v0 }
   0xa   :  { %169 = vmatpush3.bf16.msra.mxu0 %v188_v3 }
   0xb   :  { %170 = vmatprep.subr.bf16.mxu0 %v194_v0 }
   0xe   :  { %171 = vmatpush3.bf16.msra.mxu0 %v189_v4 }
   0xf   :  { %172 = vmatprep.subr.bf16.mxu0 %v194_v0 }
  0x12   :  { %173 = vmatpush3.bf16.msra.mxu0 %v190_v5 }
  0x13   :  { %174 = vmatprep.subr.bf16.mxu0 %v194_v0 }
  0x16   :  { %175 = vmatpush3.bf16.msra.mxu0 %v191_v6 }
  0x17   :  { %176 = vmatprep.subr.bf16.mxu0 %v194_v0 }
  0x1a   :  { %177 = vmatpush3.bf16.msra.mxu0 %v192_v7 }
  0x1b   :  { %178 = vmatprep.subr.bf16.mxu0 %v194_v0 }
  0x1e   :  { %179 = vmatpush3.bf16.msra.mxu0 %v193_v8 }
  0x21   :  { %181 = vmatmul.mubr.bf16.vlgmr.msra.gmra.mxu0 %v21_v9 }
  0xe1   :  { %v120_v11 = vpop.f32.mrf.mxu0 }
  0xe2   :  { %v139_v12 = vadd.f32 %v154_v10, %v120_v11 }
  0xe3   :  { %v182_v13 = vpop.f32.mrf.mxu0 }
  0xe4   :  { %v140_v14 = vmax.f32 %v139_v12, 0.0 }
  0xe5   :  { %v123_v15 = vpop.f32.mrf.mxu0 }
  0xe6   :  { %141 = vst [vmem:[%s252_s3] sm:$0xff] %v140_v14 }
  0xe7   :  { %v183_v16 = vpop.f32.mrf.mxu0 }

// kernel: gnn_embeds_forward.11
= control target key start
LH: loop header
LB: loop body
LE: loop exit
PB: predicated region body
PF: predicated region fallthrough
CT: control target
= control target key end

     0   :  { %v228_v1 = vmov 0.0   ;;  %vm229_vm0 = vmmov 0   ;;  %s284_s0 = inlined_call_operand.vmem [shape: bf16[8,128], index: 0, kind: input, shape index: {}]   ;;  %s285_s1 = inlined_call_operand.vmem [shape: bf16[128,128], index: 1, kind: input, shape index: {}]   ;;  %s286_s2 = inlined_call_operand.vmem [shape: f32[1,128], index: 2, kind: input, shape index: {}]   ;;  %s287_s3 = inlined_call_operand.hbm [shape: f32[8,128], index: 3, kind: output, shape index: {}]  }
   0x1   :  { %v198_v0 = vld [vmem:[%s285_s1 + $0x38] sm:$0xff]   ;;  %175 = vmatprep.subr.bf16.mxu0 %v228_v1  ;;  %v199_v2 = vld [vmem:[%s285_s1 + $0x30] sm:$0xff]   ;;  %191 = vmatprep.mubr.msk.bf16.mxu0 %vm229_vm0, %v228_v1  ;;  %v200_v3 = vld [vmem:[%s285_s1 + $0x28] sm:$0xff]  }
   0x2   :  { %176 = vmatpush3.bf16.msra.mxu0 %v198_v0 }
   0x3   :  { %177 = vmatprep.subr.bf16.mxu0 %v228_v1 }
   0x6   :  { %178 = vmatpush3.bf16.msra.mxu0 %v199_v2 }
   0x7   :  { %179 = vmatprep.subr.bf16.mxu0 %v228_v1 }
   0x8   :  { %8 = vsyncpa [#allocation4], 0  ;;  %v201_v4 = vld [vmem:[%s285_s1 + $0x20] sm:$0xff]   ;;  %v202_v5 = vld [vmem:[%s285_s1 + $0x18] sm:$0xff]   ;;  %s230_s5 = smov [#allocation3]  }
   0x9   :  { %v203_v6 = vld [vmem:[%s285_s1 + $0x10] sm:$0xff]   ;;  %v204_v7 = vld [vmem:[%s285_s1 + $0x8] sm:$0xff]   ;;  %v205_v8 = vld [vmem:[%s285_s1] sm:$0xff]   ;;  %s149_s6 = sshll.u32 %s230_s5, 4  ;;  %s150_s6 = int_to_ptr.vmem [resolvable:$true] %s149_s6 }
   0xa   :  { %180 = vmatpush3.bf16.msra.mxu0 %v200_v3  ;;  %v22_v9 = vld [vmem:[%s284_s0] sm:$0xf]  ;;  %s206_s1 = scalar_lea.vmem %s150_s6, 128  ;;  %p211_p1 = scmp.lt.s32.totalorder %s150_s6, %s150_s6 }
   0xb   :  { %181 = vmatprep.subr.bf16.mxu0 %v228_v1  ;;  %v165_v10 = vld [vmem:[%s286_s2] ss:$0 sm:$0xff]  ;;  %p207_p0 = scmp.ne.s32.totalorder %s150_s6, %s206_s1  ;;  %p212_p2 = scmp.lt.s32.totalorder %s206_s1, %s206_s1 }
   0xd   :  { %p213_p3 = por %p212_p2, %p211_p1 }
   0xe   :  { %182 = vmatpush3.bf16.msra.mxu0 %v201_v4 }
   0xf   :  { %183 = vmatprep.subr.bf16.mxu0 %v228_v1  ;;  %p214_p4 = pnand %p213_p3, %p207_p0 }
  0x12   :  { %184 = vmatpush3.bf16.msra.mxu0 %v202_v5 }
  0x13   :  { %185 = vmatprep.subr.bf16.mxu0 %v228_v1 }
  0x16   :  { %186 = vmatpush3.bf16.msra.mxu0 %v203_v6 }
  0x17   :  { %187 = vmatprep.subr.bf16.mxu0 %v228_v1 }
  0x1a   :  { %188 = vmatpush3.bf16.msra.mxu0 %v204_v7 }
  0x1b   :  { %189 = vmatprep.subr.bf16.mxu0 %v228_v1 }
  0x1e   :  { %190 = vmatpush3.bf16.msra.mxu0 %v205_v8 }
  0x21   :  { %192 = vmatmul.mubr.bf16.vlgmr.msra.gmra.mxu0 %v22_v9 }
  0xe1   :  { %v121_v11 = vpop.f32.mrf.mxu0 }
  0xe2   :  { %v140_v12 = vadd.f32 %v165_v10, %v121_v11 }
  0xe3   :  { %v193_v13 = vpop.f32.mrf.mxu0 }
  0xe4   :  { %v141_v14 = vmax.f32 %v140_v12, 0.0 }
  0xe5   :  { %v124_v15 = vpop.f32.mrf.mxu0 }
  0xe6   :  { %142 = vst [vmem:[#allocation3] sm:$0xff] %v141_v14 }
  0xe7   :  { %v194_v16 = vpop.f32.mrf.mxu0 }
  0xe8   :  { %217 = shalt.err (!%p214_p4)
}
  0xe9   :  { %152 = dma.vmem_to_hbm [thread:$0]  %s150_s6, 128, %s287_s3, [#allocation4]  }
  0xea   :  { %226 = dma.done.wait [#allocation4], 128  }
  0xeb   :  { %227 = vsyncadd [#allocation4], 4294967168 }
  0xec   :  { %156 = vsyncpa [#allocation4], 1 }

</bundles_post_ra>
